<compile_context>
chip_gen: v7x
topology: tpu7x:2x2x1
jax: 0.10.0
libtpu: 0.0.40
codegen_flags: <defaults>
</compile_context>

<pallas_src>
import functools

import jax
import jax.numpy as jnp
import numpy as np
from jax.experimental import pallas as pl
from jax.experimental.pallas import tpu as pltpu

EPS = 1e-5

_VMEM_LIMIT_BYTES = 32 * 1024 * 1024     # safe on v5e/v6e/v7x (raises v5e's 16 MiB default)
_FUSED_BUDGET_BYTES = 20 * 1024 * 1024   # budget for ~8x f32 copies of a whole-image block


def _affine_coeffs(s, ss, rho, gamma, beta, n_spatial, eps):
    """Per-channel fused scale/shift from per-channel sum / sumsq partials.

    s, ss, rho, gamma, beta: (1, C, 1) float32.
    Returns (a, b) with out = x * a + b  ==  gamma * (rho*IN(x) + (1-rho)*LN(x)) + beta.
    Accumulation / moment math is all f32. NOTE: the E[x^2]-mean^2 form can lose
    precision for low-precision inputs with very large means; inputs are cast to
    f32 before accumulation which is sufficient for typical activations.
    """
    c = s.shape[1]
    n_in = float(n_spatial)            # instance-norm count (H*W)
    n_ln = float(n_spatial * c)        # layer-norm count (C*H*W)

    # Instance-norm stats per channel (unbiased variance, matching torch.var).
    in_mean = s / n_in
    in_var = (ss - s * in_mean) / (n_in - 1.0)     # (sumsq - n*mean^2) / (n-1)

    # Layer-norm stats derived from the per-channel partials (no extra tile sweep).
    ln_s = jnp.sum(s, axis=1, keepdims=True)       # (1, 1, 1)
    ln_ss = jnp.sum(ss, axis=1, keepdims=True)
    ln_mean = ln_s / n_ln
    ln_var = (ln_ss - ln_s * ln_mean) / (n_ln - 1.0)

    inv_in = jax.lax.rsqrt(in_var + eps)
    inv_ln = jax.lax.rsqrt(ln_var + eps)

    mix_scale = rho * inv_in + (1.0 - rho) * inv_ln
    mix_shift = rho * in_mean * inv_in + (1.0 - rho) * ln_mean * inv_ln
    a = gamma * mix_scale
    b = beta - gamma * mix_shift
    return a, b


# ---------------------------------------------------------------------------
# Path 1: fused single-pass kernel (whole image per batch element fits VMEM).
# Reads x once, writes out once; one reduction sweep + one FMA sweep.
# ---------------------------------------------------------------------------
def iln_fused_kernel(rho_ref, gamma_ref, beta_ref, x_ref, o_ref, *, hw, eps):
    x = x_ref[...].astype(jnp.float32)                     # (1, C, HW)
    s = jnp.sum(x, axis=2, keepdims=True)                  # (1, C, 1)
    ss = jnp.sum(x * x, axis=2, keepdims=True)             # (1, C, 1)
    a, b = _affine_coeffs(
        s, ss,
        rho_ref[...].astype(jnp.float32),
        gamma_ref[...].astype(jnp.float32),
        beta_ref[...].astype(jnp.float32),
        hw, eps)
    o_ref[...] = (x * a + b).astype(o_ref.dtype)


def _iln_fused(xf, rho3, gamma3, beta3, eps):
    N, C, HW = xf.shape
    kernel = functools.partial(iln_fused_kernel, hw=HW, eps=eps)
    p_spec = pl.BlockSpec((1, C, 1), lambda b: (0, 0, 0))
    x_spec = pl.BlockSpec((1, C, HW), lambda b: (b, 0, 0))
    return pl.pallas_call(
        kernel,
        out_shape=jax.ShapeDtypeStruct((N, C, HW), xf.dtype),
        grid_spec=pltpu.PrefetchScalarGridSpec(
            num_scalar_prefetch=0,
            grid=(N,),
            in_specs=[p_spec, p_spec, p_spec, x_spec],
            out_specs=x_spec,
        ),
        compiler_params=pltpu.CompilerParams(
            dimension_semantics=("parallel",),
            vmem_limit_bytes=_VMEM_LIMIT_BYTES,
        ),
    )(rho3, gamma3, beta3, xf)


# ---------------------------------------------------------------------------
# Path 2: chunked two-pass pipeline for images too large to hold per batch.
#   Pass A: accumulate per-channel sum/sumsq over spatial chunks (chunk axis
#           "arbitrary"), finalize fused per-channel (a, b) coefficients.
#   Pass B: out = x*a + b, both grid axes "parallel" (uses v7x's 2nd core).
# ---------------------------------------------------------------------------
def iln_stats_kernel(rho_ref, gamma_ref, beta_ref, x_ref, a_ref, b_ref,
                     sum_ref, sumsq_ref, *, hw, eps):
    c = pl.program_id(1)
    nc = pl.num_programs(1)

    @pl.when(c == 0)
    def _():
        sum_ref[...] = jnp.zeros_like(sum_ref)
        sumsq_ref[...] = jnp.zeros_like(sumsq_ref)

    x = x_ref[...].astype(jnp.float32)                      # (1, C, chunk)
    sum_ref[...] += jnp.sum(x, axis=2, keepdims=True)
    sumsq_ref[...] += jnp.sum(x * x, axis=2, keepdims=True)

    @pl.when(c == nc - 1)
    def _():
        a, b = _affine_coeffs(
            sum_ref[...], sumsq_ref[...],
            rho_ref[...].astype(jnp.float32),
            gamma_ref[...].astype(jnp.float32),
            beta_ref[...].astype(jnp.float32),
            hw, eps)
        a_ref[...] = a
        b_ref[...] = b


def iln_apply_kernel(a_ref, b_ref, x_ref, o_ref):
    # Single FMA sweep; (1, C, 1) coefficients broadcast along the lane axis.
    x = x_ref[...].astype(jnp.float32)
    o_ref[...] = (x * a_ref[...] + b_ref[...]).astype(o_ref.dtype)


def _iln_stats(xf, rho3, gamma3, beta3, chunk, eps):
    N, C, HW = xf.shape
    n_chunks = HW // chunk
    kernel = functools.partial(iln_stats_kernel, hw=HW, eps=eps)
    p_spec = pl.BlockSpec((1, C, 1), lambda b, c: (0, 0, 0))
    x_spec = pl.BlockSpec((1, C, chunk), lambda b, c: (b, 0, c))
    ab_spec = pl.BlockSpec((1, C, 1), lambda b, c: (b, 0, 0))
    return pl.pallas_call(
        kernel,
        out_shape=(jax.ShapeDtypeStruct((N, C, 1), jnp.float32),
                   jax.ShapeDtypeStruct((N, C, 1), jnp.float32)),
        grid_spec=pltpu.PrefetchScalarGridSpec(
            num_scalar_prefetch=0,
            grid=(N, n_chunks),
            in_specs=[p_spec, p_spec, p_spec, x_spec],
            out_specs=[ab_spec, ab_spec],
            scratch_shapes=[pltpu.VMEM((1, C, 1), jnp.float32),
                            pltpu.VMEM((1, C, 1), jnp.float32)],
        ),
        compiler_params=pltpu.CompilerParams(
            dimension_semantics=("parallel", "arbitrary"),
            vmem_limit_bytes=_VMEM_LIMIT_BYTES,
        ),
    )(rho3, gamma3, beta3, xf)


def _iln_apply(xf, a, b, chunk):
    N, C, HW = xf.shape
    n_chunks = HW // chunk
    x_spec = pl.BlockSpec((1, C, chunk), lambda bb, c: (bb, 0, c))
    ab_spec = pl.BlockSpec((1, C, 1), lambda bb, c: (bb, 0, 0))
    return pl.pallas_call(
        iln_apply_kernel,
        out_shape=jax.ShapeDtypeStruct((N, C, HW), xf.dtype),
        grid_spec=pltpu.PrefetchScalarGridSpec(
            num_scalar_prefetch=0,
            grid=(N, n_chunks),
            in_specs=[ab_spec, ab_spec, x_spec],
            out_specs=x_spec,
        ),
        compiler_params=pltpu.CompilerParams(
            dimension_semantics=("parallel", "parallel"),
            vmem_limit_bytes=_VMEM_LIMIT_BYTES,
        ),
    )(a, b, xf)


def _pick_spatial_chunk(hw, c, budget_bytes=16 * 1024 * 1024):
    """Largest lane-aligned (multiple of 128) chunk that divides hw and keeps
    ~5 f32 copies of a (C, chunk) block under budget; falls back to full extent."""
    max_elems = max(128, budget_bytes // (5 * 4 * c))
    best = 0
    k = 128
    while k <= min(hw, max_elems):
        if hw % k == 0:
            best = k
        k += 128
    return best if best > 0 else hw


# ---------------------------------------------------------------------------
# Public wrapper
# ---------------------------------------------------------------------------
def iln_pallas(x, rho, gamma, beta, *, eps=EPS, spatial_chunk=None):
    N, C, H, W = x.shape
    HW = H * W
    # Unbiased variance divides by (n-1); degenerate shapes would divide by zero.
    assert HW > 1 and C * HW > 1, "ILN needs H*W > 1 (unbiased variance)."

    xf = x.reshape(N, C, HW)                               # lane-dense layout
    rho3 = jnp.reshape(rho, (1, C, 1)).astype(jnp.float32)
    gamma3 = jnp.reshape(gamma, (1, C, 1)).astype(jnp.float32)
    beta3 = jnp.reshape(beta, (1, C, 1)).astype(jnp.float32)

    if spatial_chunk is None:
        # Fused single-read path when the whole (C, HW) image (double-buffered
        # in/out blocks + f32 temporaries, ~8x the block) fits comfortably.
        if 8 * C * HW * 4 <= _FUSED_BUDGET_BYTES:
            return _iln_fused(xf, rho3, gamma3, beta3, eps).reshape(N, C, H, W)
        spatial_chunk = _pick_spatial_chunk(HW, C)
    else:
        assert HW % spatial_chunk == 0 and (spatial_chunk % 128 == 0 or spatial_chunk == HW), (
            "spatial_chunk must divide H*W and be a multiple of 128 (or the full extent)")

    a, b = _iln_stats(xf, rho3, gamma3, beta3, spatial_chunk, eps)
    out = _iln_apply(xf, a, b, spatial_chunk)
    return out.reshape(N, C, H, W)


def iln_reference(x, rho, gamma, beta, eps=EPS):
    # Pure-JAX reference matching torch semantics (unbiased variance).
    in_mean = jnp.mean(x, axis=(2, 3), keepdims=True)
    in_var = jnp.var(x, axis=(2, 3), keepdims=True, ddof=1)
    ln_mean = jnp.mean(x, axis=(1, 2, 3), keepdims=True)
    ln_var = jnp.var(x, axis=(1, 2, 3), keepdims=True, ddof=1)
    out_in = (x - in_mean) / jnp.sqrt(in_var + eps)
    out_ln = (x - ln_mean) / jnp.sqrt(ln_var + eps)
    out = rho * out_in + (1.0 - rho) * out_ln
    return out * gamma + beta


if __name__ == "__main__":
    key = jax.random.PRNGKey(0)
    kx, kr, kg, kb = jax.random.split(key, 4)
    N, C, H, W = 2, 4, 16, 16

    x = jax.random.normal(kx, (N, C, H, W), dtype=jnp.float32)
    # Deterministic but non-trivial parameters so the rho mix, gamma and beta
    # terms are all exercised (module init would be rho=0, gamma=1, beta=0).
    rho = jax.random.uniform(kr, (1, C, 1, 1), dtype=jnp.float32)
    gamma = 1.0 + 0.1 * jax.random.normal(kg, (1, C, 1, 1), dtype=jnp.float32)
    beta = 0.1 * jax.random.normal(kb, (1, C, 1, 1), dtype=jnp.float32)

    ref = iln_reference(x, rho, gamma, beta)

    # Path 1: fused single-pass whole-image kernel (auto-selected at this size).
    out_fused = jax.block_until_ready(iln_pallas(x, rho, gamma, beta))
    np.testing.assert_allclose(np.asarray(out_fused), np.asarray(ref), rtol=2e-5, atol=2e-5)

    # Path 2: chunked two-pass pipeline (forced with a 128-lane chunk) — the
    # VMEM-safe path used for realistic CycleGAN-sized feature maps.
    out_chunked = jax.block_until_ready(iln_pallas(x, rho, gamma, beta, spatial_chunk=128))
    np.testing.assert_allclose(np.asarray(out_chunked), np.asarray(ref), rtol=2e-5, atol=2e-5)

    print("KERNEL_OK")
</pallas_src>

<mosaic_0001>
module attributes {stable_mosaic.version = 11 : i64} {
  func.func @iln_fused_kernel(%arg0: i32, %arg1: memref<1x4x1xf32, #tpu.memory_space<vmem>>, %arg2: memref<1x4x1xf32, #tpu.memory_space<vmem>>, %arg3: memref<1x4x1xf32, #tpu.memory_space<vmem>>, %arg4: memref<1x4x256xf32, #tpu.memory_space<vmem>>, %arg5: memref<1x4x256xf32, #tpu.memory_space<vmem>>) attributes {dimension_semantics = [#tpu.dimension_semantics<parallel>], iteration_bounds = array<i64: 2>, scalar_prefetch = 0 : i64, scratch_operands = 0 : i64, tpu.core_type = #tpu.core_type<tc>, window_params = [{pipeline_mode = #tpu.pipeline_mode<synchronous>, transform_indices = @transform_0, window_bounds = array<i64: 1, 4, 1>}, {pipeline_mode = #tpu.pipeline_mode<synchronous>, transform_indices = @transform_1, window_bounds = array<i64: 1, 4, 1>}, {pipeline_mode = #tpu.pipeline_mode<synchronous>, transform_indices = @transform_2, window_bounds = array<i64: 1, 4, 1>}, {transform_indices = @transform_3, window_bounds = array<i64: 1, 4, 256>}, {transform_indices = @transform_4, window_bounds = array<i64: 1, 4, 256>}]} {
    %c0 = arith.constant 0 : index
    %c0_0 = arith.constant 0 : index
    %c0_1 = arith.constant 0 : index
    %0 = vector.load %arg4[%c0, %c0_0, %c0_1] : memref<1x4x256xf32, #tpu.memory_space<vmem>>, vector<1x4x256xf32>
    %cst = arith.constant dense<0.000000e+00> : vector<1x4xf32>
    %1 = vector.multi_reduction <add>, %0, %cst [2] : vector<1x4x256xf32> to vector<1x4xf32>
    %2 = vector.shape_cast %1 : vector<1x4xf32> to vector<1x4x1xf32>
    %3 = arith.mulf %0, %0 : vector<1x4x256xf32>
    %cst_2 = arith.constant dense<0.000000e+00> : vector<1x4xf32>
    %4 = vector.multi_reduction <add>, %3, %cst_2 [2] : vector<1x4x256xf32> to vector<1x4xf32>
    %5 = vector.shape_cast %4 : vector<1x4xf32> to vector<1x4x1xf32>
    %c0_3 = arith.constant 0 : index
    %c0_4 = arith.constant 0 : index
    %c0_5 = arith.constant 0 : index
    %6 = vector.load %arg1[%c0_3, %c0_4, %c0_5] : memref<1x4x1xf32, #tpu.memory_space<vmem>>, vector<1x4x1xf32>
    %c0_6 = arith.constant 0 : index
    %c0_7 = arith.constant 0 : index
    %c0_8 = arith.constant 0 : index
    %7 = vector.load %arg2[%c0_6, %c0_7, %c0_8] : memref<1x4x1xf32, #tpu.memory_space<vmem>>, vector<1x4x1xf32>
    %c0_9 = arith.constant 0 : index
    %c0_10 = arith.constant 0 : index
    %c0_11 = arith.constant 0 : index
    %8 = vector.load %arg3[%c0_9, %c0_10, %c0_11] : memref<1x4x1xf32, #tpu.memory_space<vmem>>, vector<1x4x1xf32>
    %cst_12 = arith.constant 2.560000e+02 : f32
    %9 = vector.broadcast %cst_12 : f32 to vector<1x4x1xf32>
    %10 = arith.divf %2, %9 : vector<1x4x1xf32>
    %11 = arith.mulf %2, %10 : vector<1x4x1xf32>
    %12 = arith.subf %5, %11 : vector<1x4x1xf32>
    %cst_13 = arith.constant 2.550000e+02 : f32
    %13 = vector.broadcast %cst_13 : f32 to vector<1x4x1xf32>
    %14 = arith.divf %12, %13 : vector<1x4x1xf32>
    %cst_14 = arith.constant dense<0.000000e+00> : vector<1x1xf32>
    %15 = vector.multi_reduction <add>, %2, %cst_14 [1] : vector<1x4x1xf32> to vector<1x1xf32>
    %16 = vector.shape_cast %15 : vector<1x1xf32> to vector<1x1x1xf32>
    %cst_15 = arith.constant dense<0.000000e+00> : vector<1x1xf32>
    %17 = vector.multi_reduction <add>, %5, %cst_15 [1] : vector<1x4x1xf32> to vector<1x1xf32>
    %18 = vector.shape_cast %17 : vector<1x1xf32> to vector<1x1x1xf32>
    %cst_16 = arith.constant 1.024000e+03 : f32
    %19 = vector.broadcast %cst_16 : f32 to vector<1x1x1xf32>
    %20 = arith.divf %16, %19 : vector<1x1x1xf32>
    %21 = arith.mulf %16, %20 : vector<1x1x1xf32>
    %22 = arith.subf %18, %21 : vector<1x1x1xf32>
    %cst_17 = arith.constant 1.023000e+03 : f32
    %23 = vector.broadcast %cst_17 : f32 to vector<1x1x1xf32>
    %24 = arith.divf %22, %23 : vector<1x1x1xf32>
    %cst_18 = arith.constant 9.99999974E-6 : f32
    %25 = vector.broadcast %cst_18 : f32 to vector<1x4x1xf32>
    %26 = arith.addf %14, %25 : vector<1x4x1xf32>
    %27 = math.rsqrt %26 : vector<1x4x1xf32>
    %cst_19 = arith.constant 9.99999974E-6 : f32
    %28 = vector.broadcast %cst_19 : f32 to vector<1x1x1xf32>
    %29 = arith.addf %24, %28 : vector<1x1x1xf32>
    %30 = math.rsqrt %29 : vector<1x1x1xf32>
    %31 = arith.mulf %6, %27 : vector<1x4x1xf32>
    %cst_20 = arith.constant 1.000000e+00 : f32
    %32 = vector.broadcast %cst_20 : f32 to vector<1x4x1xf32>
    %33 = arith.subf %32, %6 : vector<1x4x1xf32>
    %34 = vector.broadcast %30 : vector<1x1x1xf32> to vector<1x4x1xf32>
    %35 = arith.mulf %33, %34 : vector<1x4x1xf32>
    %36 = arith.addf %31, %35 : vector<1x4x1xf32>
    %37 = arith.mulf %6, %10 : vector<1x4x1xf32>
    %38 = arith.mulf %37, %27 : vector<1x4x1xf32>
    %cst_21 = arith.constant 1.000000e+00 : f32
    %39 = vector.broadcast %cst_21 : f32 to vector<1x4x1xf32>
    %40 = arith.subf %39, %6 : vector<1x4x1xf32>
    %41 = vector.broadcast %20 : vector<1x1x1xf32> to vector<1x4x1xf32>
    %42 = arith.mulf %40, %41 : vector<1x4x1xf32>
    %43 = vector.broadcast %30 : vector<1x1x1xf32> to vector<1x4x1xf32>
    %44 = arith.mulf %42, %43 : vector<1x4x1xf32>
    %45 = arith.addf %38, %44 : vector<1x4x1xf32>
    %46 = arith.mulf %7, %36 : vector<1x4x1xf32>
    %47 = arith.mulf %7, %45 : vector<1x4x1xf32>
    %48 = arith.subf %8, %47 : vector<1x4x1xf32>
    %49 = vector.broadcast %46 : vector<1x4x1xf32> to vector<1x4x256xf32>
    %50 = arith.mulf %0, %49 : vector<1x4x256xf32>
    %51 = vector.broadcast %48 : vector<1x4x1xf32> to vector<1x4x256xf32>
    %52 = arith.addf %50, %51 : vector<1x4x256xf32>
    %c0_22 = arith.constant 0 : index
    %c0_23 = arith.constant 0 : index
    %c0_24 = arith.constant 0 : index
    %53 = vector.load %arg5[%c0_22, %c0_23, %c0_24] : memref<1x4x256xf32, #tpu.memory_space<vmem>>, vector<1x4x256xf32>
    tpu.vector_store %arg5[%c0_22, %c0_23, %c0_24], %52 {strides = array<i32>} : memref<1x4x256xf32, #tpu.memory_space<vmem>>, vector<1x4x256xf32>,
    return
  }
  func.func @transform_0(%arg0: i32) -> (i32, i32, i32) {
    %c0_i32 = arith.constant 0 : i32
    %c0_i32_0 = arith.constant 0 : i32
    %c0_i32_1 = arith.constant 0 : i32
    %c0_i32_2 = arith.constant 0 : i32
    return %c0_i32, %c0_i32_0, %c0_i32_1 : i32, i32, i32
  }
  func.func @transform_1(%arg0: i32) -> (i32, i32, i32) {
    %c0_i32 = arith.constant 0 : i32
    %c0_i32_0 = arith.constant 0 : i32
    %c0_i32_1 = arith.constant 0 : i32
    %c0_i32_2 = arith.constant 0 : i32
    return %c0_i32, %c0_i32_0, %c0_i32_1 : i32, i32, i32
  }
  func.func @transform_2(%arg0: i32) -> (i32, i32, i32) {
    %c0_i32 = arith.constant 0 : i32
    %c0_i32_0 = arith.constant 0 : i32
    %c0_i32_1 = arith.constant 0 : i32
    %c0_i32_2 = arith.constant 0 : i32
    return %c0_i32, %c0_i32_0, %c0_i32_1 : i32, i32, i32
  }
  func.func @transform_3(%arg0: i32) -> (i32, i32, i32) {
    %c0_i32 = arith.constant 0 : i32
    %c0_i32_0 = arith.constant 0 : i32
    %c0_i32_1 = arith.constant 0 : i32
    return %arg0, %c0_i32, %c0_i32_0 : i32, i32, i32
  }
  func.func @transform_4(%arg0: i32) -> (i32, i32, i32) {
    %c0_i32 = arith.constant 0 : i32
    %c0_i32_0 = arith.constant 0 : i32
    %c0_i32_1 = arith.constant 0 : i32
    return %arg0, %c0_i32, %c0_i32_0 : i32, i32, i32
  }
}

</mosaic_0001>

<bundles_post_ra>
// kernel: tpu_custom_call.1
= control target key start
LH: loop header
LB: loop body
LE: loop exit
PB: predicated region body
PF: predicated region fallthrough
CT: control target
= control target key end

     0   :  { %9 = vsyncpa [#allocation3], 0  ;;  %s638_s0 = inlined_call_operand.vmem [shape: f32[1,4,1], index: 0, kind: input, shape index: {}]   ;;  %s639_s1 = inlined_call_operand.vmem [shape: f32[1,4,1], index: 1, kind: input, shape index: {}]   ;;  %s640_s2 = inlined_call_operand.vmem [shape: f32[1,4,1], index: 2, kind: input, shape index: {}]   ;;  %s641_s3 = inlined_call_operand.vmem [shape: f32[2,4,256], index: 3, kind: input, shape index: {}]   ;;  %s642_s4 = inlined_call_operand.hbm [shape: f32[2,4,256], index: 4, kind: output, shape index: {}]  }
   0x1   :  { %11 = vsyncpa [#allocation3 + $0x1], 0  ;;  %s515_s15 = smov 0   ;;  %s517_s16 = smov 0  }
   0x2   :  { %s519_s17 = smov 0   ;;  %s521_s18 = smov 0  }
   0x3 LB: > { %s536_s19 = sadd.s32 4294967295, %s485_s18   ;;  %s361_s20 = sadd.s32 4294967294, %s485_s18   ;;  %s485_s18 = sphi %s521_s18, %s648_s18   ;;  %s481_s17 = sphi %s519_s17, %s647_s17   ;;  %s477_s16 = sphi %s517_s16, %s646_s16   ;;  %s473_s15 = sphi %s515_s15, %s645_s15  }
   0x4   : > { %s540_s21 = sadd.s32 1, %s485_s18   ;;  %s113_s22 = sadd.s32 1, %s481_s17 }
   0x5   : > { %s110_s23 = ssub.s32 %s485_s18, %s540_s21  ;;  %p123_p0 = scmp.ne.s32.totalorder %s481_s17, %s477_s16 }
   0x6   : > { %p111_p1 = scmp.eq.s32.totalorder %s110_s23, 0  ;;  %p124_p2 = scmp.eq.s32.totalorder %s536_s19, 1 }
   0x7   : > { %p129_p3 = scmp.ne.s32.totalorder %s477_s16, %s473_s15  ;;  %p130_p4 = scmp.eq.s32.totalorder %s361_s20, 1 }
   0x8   : > { %s551_s24 = scalar_select %p111_p1, %s481_s17, %s113_s22  }
   0x9   : > { %p553_p5 = por %p124_p2, %p123_p0  ;;  %p557_p6 = por %p130_p4, %p129_p3 }
   0xa   : > { %p364_p7 = scmp.ge.s32.totalorder %s485_s18, 1  ;;  %p165_p8 = scmp.lt.s32.totalorder %s485_s18, 3 }
   0xc   : > { %p166_p9 = pnand %p364_p7, %p165_p8 }
   0xd   : > { %p191_p10 = scmp.lt.s32.totalorder (!%p166_p9), %s536_s19, 1  ;;  %vm200_vm0 = vcmask (!%p166_p9), 1043456   ;;  %v487_v10 = vmov (!%p166_p9), 0   ;;  %v215_v37 = vld [vmem:[%s638_s0] sm:$0xf] (!%p166_p9)  ;;  %v267_v56 = vlaneseq (!%p166_p9)  ;;  %s188_s12 = sand.u32 (!%p166_p9), 1, %s477_s16  }
   0xe   : > { %169 = sbr.rel (%p166_p9) target bundleno = 363 (0x16b), region = 36  ;;  %416 = vset.pattern.permute.xlu1 (!%p166_p9), %v487_v10  ;;  %417 = vset.pattern.permute.xlu0 (!%p166_p9), %v487_v10  ;;  %v249_v38 = vsub.f32 (!%p166_p9), 1.0, %v215_v37  ;;  %v216_v47 = vld [vmem:[%s639_s1] sm:$0xf] (!%p166_p9)  ;;  %v488_v54 = vmov (!%p166_p9), 839922192  }
   0xf   : > { %v217_v52 = vld [vmem:[%s640_s2] sm:$0xf] (!%p166_p9)  ;;  %v265_v55 = vunpack.c.l.s4 (!%p166_p9), %v488_v54  ;;  %v268_v58 = vshrl.u32 (!%p166_p9), %v267_v56, 7  ;;  %s365_s13 = sshll.u32 (!%p166_p9), %s188_s12, 3  ;;  %s374_s14 = sshll.u32 (!%p166_p9), %s536_s19, 7 }
  0x10   : > { %s190_s20 = scalar_lea.vmem (!%p166_p9), [#allocation2], %s365_s13  ;;  %s288_s29 = scalar_lea.sflag (!%p166_p9), [#allocation3], %s188_s12 }
  0x11   : > { %v266_v57 = vunpack.c.0.s8 (!%p166_p9), %v265_v55  ;;  %s302_s22 = sshll.u32 (!%p166_p9), %s190_s20, 4  ;;  %s598_s22 = int_to_ptr.vmem [resolvable:$true] %s302_s22 }
  0x12   : > { %s423_s30 = scalar_lea.vmem (!%p166_p9), %s598_s22, 128 }
  0x13   : > { %v269_v59 = vsub.s32 (!%p166_p9), %v266_v57, %v268_v58  ;;  %p424_p11 = scmp.ne.s32.totalorder (!%p166_p9), %s598_s22, %s423_s30 }
  0x15   : > { %s192_s27 = scalar_select %p191_p10, %s536_s19, 1 }
  0x16   : > { %p425_p12 = pnand %p424_p11, %p553_p5  ;;  %s489_s19 = smov [#allocation2]  }
  0x17   : > { %s373_s28 = sshll.u32 %s192_s27, 3 }
  0x18   : > { %s195_s5 = scalar_lea.vmem %s641_s3, %s373_s28  ;;  %s596_s28 = scalar_lea.hbm %s642_s4, %s374_s14 }
  0x19   : > { %v568_v0 = vld [vmem:[%s195_s5] sm:$0xff]  ;;  %p426_p13 = pneg %p425_p12  ;;  %s427_s5 = sshll.u32 %s489_s19, 4  ;;  %s428_s5 = int_to_ptr.vmem [resolvable:$false] %s427_s5 }
  0x1a   : > { %v198_v1 = vcombine.high %v568_v0, %v568_v0  ;;  %v201_v2 = vsel %vm200_vm0, %v568_v0, 0.0  ;;  %v206_v3 = vmul.f32 %v568_v0, %v568_v0  ;;  %s429_s6 = scalar_lea.vmem %s428_s5, 256  ;;  %p430_p0 = scmp.lt.s32.totalorder %s598_s22, %s428_s5 }
  0x1b   : > { %p431_p1 = scmp.lt.s32.totalorder %s429_s6, %s423_s30 }
  0x1c   : > { %v202_v4 = vsel %vm200_vm0, %v198_v1, 0.0  ;;  %v208_v5 = vcombine.high %v206_v3, %v206_v3  ;;  %v210_v6 = vsel %vm200_vm0, %v206_v3, 0.0 }
  0x1d   : > { %v203_v7 = vadd.f32 %v202_v4, %v201_v2  ;;  %p432_p2 = por %p431_p1, %p430_p0 }
  0x1e   : > { %v211_v8 = vsel %vm200_vm0, %v208_v5, 0.0 }
  0x1f   : > { %204 = vadd.xlane.f32.xlu0 %v203_v7  ;;  %v212_v9 = vadd.f32 %v211_v8, %v210_v6  ;;  %p433_p3 = pnand %p432_p2, %p426_p13 }
  0x23   : > { %213 = vadd.xlane.f32.xlu0 %v212_v9 }
  0xac   : > { %v205_v11 = vpop.xlane.xlu0 %204 }
  0xad   : > { %v224_v12 = vsel %vm200_vm0, %v205_v11, 0.0  ;;  %v219_v13 = vmul.f32 0.00390625, %v205_v11 }
  0xae   : > { %v225_v14 = vrot.slane %v224_v12, 4 }
  0xaf   : > { %v220_v19 = vmul.f32 %v219_v13, %v205_v11  ;;  %v252_v40 = vmul.f32 %v219_v13, %v215_v37 }
  0xb0   : > { %v226_v15 = vadd.f32 %v225_v14, %v224_v12  ;;  %v214_v16 = vpop.xlane.xlu0 %213 }
  0xb1   : > { %v231_v17 = vsel %vm200_vm0, %v214_v16, 0.0  ;;  %v221_v24 = vsub.f32 %v214_v16, %v220_v19 }
  0xb2   : > { %v227_v18 = vrot.slane %v226_v15, 2  ;;  %v232_v20 = vrot.slane %v231_v17, 4 }
  0xb3   : > { %v223_v29 = vmul.f32 0.003921569, %v221_v24 }
  0xb4   : > { %v228_v21 = vadd.f32 %v227_v18, %v226_v15  ;;  %v233_v22 = vadd.f32 %v232_v20, %v231_v17 }
  0xb5   : > { %v244_v34 = vadd.f32 1e-05, %v223_v29 }
  0xb6   : > { %v229_v23 = vrot.slane %v228_v21, 1  ;;  %v234_v25 = vrot.slane %v233_v22, 2 }
  0xb7   : > { %419 = vrsqrt.f32 %v244_v34 }
  0xb8   : > { %v230_v26 = vadd.f32 %v229_v23, %v228_v21  ;;  %v235_v27 = vadd.f32 %v234_v25, %v233_v22 }
  0xba   : > { %v239_v28 = vmul.f32 0.0009765625, %v230_v26  ;;  %v236_v30 = vrot.slane %v235_v27, 1 }
  0xbc   : > { %v240_v31 = vmul.f32 %v239_v28, %v230_v26  ;;  %v237_v32 = vadd.f32 %v236_v30, %v235_v27  ;;  %v254_v41 = vmul.f32 %v249_v38, %v239_v28 }
  0xbe   : > { %v241_v33 = vsub.f32 %v237_v32, %v240_v31 }
  0xc0   : > { %v243_v35 = vmul.f32 0.0009775171, %v241_v33 }
  0xc1   : > { %v420_v39 = vpop.eup %419 }
  0xc2   : > { %v246_v36 = vadd.f32 1e-05, %v243_v35  ;;  %v248_v43 = vmul.f32 %v420_v39, %v215_v37  ;;  %v253_v45 = vmul.f32 %v420_v39, %v252_v40 }
  0xc4   : > { %421 = vrsqrt.f32 %v246_v36 }
  0xce   : > { %v422_v42 = vpop.eup %421 }
  0xcf   : > { %v250_v44 = vmul.f32 %v422_v42, %v249_v38  ;;  %v255_v46 = vmul.f32 %v422_v42, %v254_v41 }
  0xd1   : > { %v251_v48 = vadd.f32 %v250_v44, %v248_v43  ;;  %v256_v49 = vadd.f32 %v255_v46, %v253_v45 }
  0xd3   : > { %v257_v50 = vmul.f32 %v251_v48, %v216_v47  ;;  %v258_v51 = vmul.f32 %v256_v49, %v216_v47 }
  0xd5   : > { %262 = vperm.xlu1 %416, %v257_v50   ;;  %v259_v53 = vsub.f32 %v217_v52, %v258_v51 }
  0xd9   : > { %275 = vperm.xlu1 %416, %v259_v53  }
 0x154   : > { %v263_v60 = vpop.permute.xlu1 %262 }
 0x155   : > { %v270_v61 = vrot.slane %v263_v60, %v269_v59 }
 0x157   : > { %v272_v63 = vmul.f32 %v270_v61, %v568_v0 }
 0x158   : > { %v276_v62 = vpop.permute.xlu1 %275 }
 0x159   : > { %v283_v1 = vrot.slane %v276_v62, %v269_v59 }
 0x15b   : > { %v285_v2 = vadd.f32 %v283_v1, %v272_v63 }
 0x15d   : > { %286 = vst [vmem:[%s190_s20] sm:$0xff] %v285_v2 }
 0x15e   : > { %436 = shalt.err (!%p433_p3)
}
 0x15f   : > { %s437_s7 = scalar_lea.hbm %s596_s28, 128  ;;  %s441_s10 = scalar_lea.hbm %s642_s4, 256 }
 0x160   : > { %p438_p4 = scmp.ne.s32.totalorder %s596_s28, %s437_s7  ;;  %p442_p9 = scmp.lt.u32.totalorder %s596_s28, %s642_s4 }
 0x161   : > { %p443_p10 = scmp.lt.u32.totalorder %s441_s10, %s437_s7  ;;  %p445_p12 = scmp.lt.u32.totalorder %s437_s7, %s596_s28 }
 0x162   : > { %p439_p7 = pnand %p438_p4, %p553_p5 }
 0x163   : > { %p444_p11 = por %p443_p10, %p442_p9 }
 0x164   : > { %p440_p8 = pneg %p439_p7 }
 0x165   : > { %p446_p13 = por %p445_p12, %p444_p11 }
 0x167   : > { %p447_p0 = pnand %p446_p13, %p440_p8 }
 0x169   : > { %450 = shalt.err (!%p447_p0)
}
 0x16a   : > { %375 = dma.vmem_to_hbm [thread:$0]  (%p553_p5), %s598_s22, 128, %s596_s28, %s288_s29  }
 0x16b PF: > { %p381_p1 = scmp.ge.s32.totalorder %s485_s18, 2  ;;  %s314_s13 = sand.u32 1, %s473_s15  }
 0x16c   : > { %s315_s14 = scalar_lea.sflag [#allocation3], %s314_s13 }
 0x16d   : > { %p378_p2 = pnand %p381_p1, %p557_p6 }
 0x16f   : > { %468 = dma.done.wait (!%p378_p2), %s315_s14, 128  }
 0x170   : > { %470 = vsyncadd (!%p378_p2), %s315_s14, 4294967168  ;;  %p14_p3 = scmp.ge.s32.totalorder %s540_s21, 4   ;;  %s645_s15 = smov %s477_s16 }
 0x171   : > { %s646_s16 = smov %s481_s17  ;;  %s647_s17 = smov %s551_s24 }
 0x172   : > { %s648_s18 = smov %s540_s21  ;;  %16 = sbr.rel (!%p14_p3) target bundleno = 3 (0x3), region = 71 }
 0x179   :  { %320 = vsyncpa [#allocation3], 1 }
 0x17a   :  { %322 = vsyncpa [#allocation3 + $0x1], 1 }

</bundles_post_ra>
